<compile_context>
chip_gen: v7x
topology: tpu7x:2x2x1
jax: 0.10.0
libtpu: 0.0.40
codegen_flags: <defaults>
</compile_context>

<pallas_src>
import functools

import jax
import jax.numpy as jnp
from jax.experimental import pallas as pl
from jax.experimental.pallas import tpu as pltpu


_VMEM_LIMIT = 32 * 1024 * 1024
_BN_EPS = 1e-5


def _round_up(v, m):
    return (v + m - 1) // m * m


def _mxu_tile_cap():
    """256-wide tiles on v6e/v7x (2x256x256 MXU), 128 on older chips."""
    try:
        kind = jax.devices()[0].device_kind.lower()
    except Exception:
        return 128
    if any(t in kind for t in ("v2", "v3", "v4", "v5")):
        return 128
    return 256


_TILE_CAP = _mxu_tile_cap()


def _pick_tile(dim, cap, align):
    """Pick (tile, padded_dim) with tile % align == 0 and tile | padded_dim."""
    if dim <= cap:
        t = _round_up(dim, align)
        return t, t
    return cap, _round_up(dim, cap)


def _buffered_kwargs(k_steps):
    """pipeline_mode=Buffered(3) for long-K reductions, when supported."""
    if k_steps < 8:
        return {}
    try:
        kw = {"pipeline_mode": pl.Buffered(3)}
        pl.BlockSpec((8, 128), lambda i, j, k: (i, k), **kw)  # probe API support
        return kw
    except Exception:
        return {}


# ---------------------------------------------------------------------------
# Pallas kernels
# ---------------------------------------------------------------------------

def _matmul_bias_kernel(x_ref, w_ref, b_ref, o_ref):
    """Tiled (M,K)@(K,N) + bias; f32 accumulation directly in the output block
    (resident across the K grid axis), bias written as the k==0 init."""
    @pl.when(pl.program_id(2) == 0)
    def _():
        o_ref[...] = jnp.broadcast_to(b_ref[...], o_ref.shape)

    o_ref[...] += jnp.dot(x_ref[...], w_ref[...],
                          preferred_element_type=jnp.float32)


def matmul_bias(x, w, b):
    """y = x @ w + b on the MXU (bf16 inputs, f32 accumulate, fused bias)."""
    m, k = x.shape
    _, n = w.shape
    cap = _TILE_CAP
    tm, mp = _pick_tile(m, cap, 8)
    tn, np_ = _pick_tile(n, cap, 128)
    # Keep >=2 blocks on a parallel axis for dual-TensorCore chips (v7x) when
    # the matmul would otherwise collapse to a single (M,N) tile.
    if mp == tm and np_ == tn and tn >= 256:
        tn //= 2
    kp = _round_up(k, 128)
    tk = next(c for c in (512, 384, 256, 128) if kp % c == 0)
    k_steps = kp // tk

    # TODO(synk): ragged M/N edges are still handled by jnp.pad + output slice
    # rather than in-kernel masked stores; padding is near-minimal with the
    # adaptive tiles above.
    xp = jnp.pad(x.astype(jnp.bfloat16), ((0, mp - m), (0, kp - k)))
    wp = jnp.pad(w.astype(jnp.bfloat16), ((0, kp - k), (0, np_ - n)))
    bp = jnp.pad(b.reshape(1, -1).astype(jnp.float32), ((0, 0), (0, np_ - n)))

    buf = _buffered_kwargs(k_steps)
    out = pl.pallas_call(
        _matmul_bias_kernel,
        out_shape=jax.ShapeDtypeStruct((mp, np_), jnp.float32),
        grid_spec=pltpu.PrefetchScalarGridSpec(
            num_scalar_prefetch=0,
            grid=(mp // tm, np_ // tn, k_steps),
            in_specs=[
                pl.BlockSpec((tm, tk), lambda i, j, kk: (i, kk), **buf),
                pl.BlockSpec((tk, tn), lambda i, j, kk: (kk, j), **buf),
                pl.BlockSpec((1, tn), lambda i, j, kk: (0, j)),
            ],
            out_specs=pl.BlockSpec((tm, tn), lambda i, j, kk: (i, j)),
        ),
        compiler_params=pltpu.CompilerParams(
            dimension_semantics=("parallel", "parallel", "arbitrary"),
            vmem_limit_bytes=_VMEM_LIMIT),
    )(xp, wp, bp)
    if mp != m or np_ != n:
        out = out[:m, :n]
    return out


def _bn_stats_kernel(x_ref, o_ref):
    """Accumulate per-channel sum (row 0) and sum of squares (row 1)."""
    x = x_ref[...].astype(jnp.float32)
    s = jnp.sum(x, axis=0, keepdims=True)
    ss = jnp.sum(x * x, axis=0, keepdims=True)
    pad = jnp.zeros((6, x.shape[1]), jnp.float32)  # keep an aligned 8-row block
    st = jnp.concatenate([s, ss, pad], axis=0)

    @pl.when(pl.program_id(1) == 0)
    def _():
        o_ref[...] = jnp.zeros_like(o_ref)

    o_ref[...] += st


def _bn_apply_kernel(x_ref, scale_ref, shift_ref, o_ref, *, relu):
    y = x_ref[...].astype(jnp.float32) * scale_ref[...] + shift_ref[...]
    if relu:
        y = jnp.maximum(y, 0.0)
    o_ref[...] = y.astype(o_ref.dtype)


def _bn_apply_res_kernel(x_ref, r_ref, scale_ref, shift_ref, o_ref):
    """BN scale/shift + residual add + ReLU, fused (bottleneck bn3 path)."""
    y = x_ref[...].astype(jnp.float32) * scale_ref[...] + shift_ref[...]
    y = jnp.maximum(y + r_ref[...].astype(jnp.float32), 0.0)
    o_ref[...] = y.astype(o_ref.dtype)


@functools.partial(jax.jit, static_argnames=("relu",))
def batchnorm2d(x, gamma, beta, residual=None, *, relu=False):
    """nn.BatchNorm2d in (default) training mode: batch stats over N,H,W.

    Two-pass tiled implementation: pass 1 accumulates per-channel sum/sumsq
    over row blocks; pass 2 applies scale/shift (+ optional residual + ReLU)
    block by block, so VMEM usage is bounded regardless of activation size.
    """
    n, h, w, c = x.shape
    m = n * h * w
    x2d = x.reshape(m, c)

    cp = _round_up(c, 128)
    tc = min(cp, 1024)
    while cp % tc:
        tc -= 128
    tr = min(256, _round_up(m, 8))
    mp = _round_up(m, tr)

    xpad = jnp.pad(x2d, ((0, mp - m), (0, cp - c)))

    # Pass 1: per-channel sum / sum-of-squares (zero-padded rows contribute 0).
    stats = pl.pallas_call(
        _bn_stats_kernel,
        out_shape=jax.ShapeDtypeStruct((8, cp), jnp.float32),
        grid_spec=pltpu.PrefetchScalarGridSpec(
            num_scalar_prefetch=0,
            grid=(cp // tc, mp // tr),
            in_specs=[pl.BlockSpec((tr, tc), lambda cb, rb: (rb, cb))],
            out_specs=pl.BlockSpec((8, tc), lambda cb, rb: (0, cb)),
        ),
        compiler_params=pltpu.CompilerParams(
            dimension_semantics=("parallel", "arbitrary"),
            vmem_limit_bytes=_VMEM_LIMIT),
    )(xpad)

    mean = stats[0] / m
    var = jnp.maximum(stats[1] / m - mean * mean, 0.0)
    gp = jnp.pad(gamma.astype(jnp.float32), (0, cp - c))
    bp = jnp.pad(beta.astype(jnp.float32), (0, cp - c))
    scale1d = gp * jax.lax.rsqrt(var + _BN_EPS)
    shift1d = bp - mean * scale1d
    scale = scale1d.reshape(1, cp)
    shift = shift1d.reshape(1, cp)

    # Pass 2: normalize (+ optional fused residual add + ReLU), tiled.
    x_spec = pl.BlockSpec((tr, tc), lambda i, j: (i, j))
    v_spec = pl.BlockSpec((1, tc), lambda i, j: (0, j))
    if residual is None:
        kern = functools.partial(_bn_apply_kernel, relu=relu)
        operands = (xpad, scale, shift)
        in_specs = [x_spec, v_spec, v_spec]
    else:
        r2d = jnp.pad(residual.reshape(m, c), ((0, mp - m), (0, cp - c)))
        kern = _bn_apply_res_kernel
        operands = (xpad, r2d, scale, shift)
        in_specs = [x_spec, x_spec, v_spec, v_spec]

    out = pl.pallas_call(
        kern,
        out_shape=jax.ShapeDtypeStruct((mp, cp), x.dtype),
        grid_spec=pltpu.PrefetchScalarGridSpec(
            num_scalar_prefetch=0,
            grid=(mp // tr, cp // tc),
            in_specs=in_specs,
            out_specs=x_spec,
        ),
        compiler_params=pltpu.CompilerParams(
            dimension_semantics=("parallel", "parallel"),
            vmem_limit_bytes=_VMEM_LIMIT),
    )(*operands)
    return out[:m, :c].reshape(n, h, w, c)


def _gap_kernel(x_ref, o_ref):
    o_ref[...] = jnp.mean(x_ref[...].astype(jnp.float32), axis=1,
                          keepdims=True).astype(o_ref.dtype)


@jax.jit
def global_avg_pool(x):
    """nn.AdaptiveAvgPool2d((1,1)) on NHWC."""
    n, h, w, c = x.shape
    x3 = x.reshape(n, h * w, c)
    vmem = pl.BlockSpec(memory_space=pltpu.MemorySpace.VMEM)
    out = pl.pallas_call(
        _gap_kernel,
        out_shape=jax.ShapeDtypeStruct((n, 1, c), x.dtype),
        in_specs=[vmem], out_specs=vmem,
    )(x3)
    return out.reshape(n, 1, 1, c)


# ---------------------------------------------------------------------------
# Conv2d = patch matrix (glue) + Pallas matmul (hot path)
# ---------------------------------------------------------------------------

@functools.partial(jax.jit, static_argnames=("stride", "padding", "dilation"))
def conv2d(x, w, b=None, *, stride=1, padding=0, dilation=1):
    """NHWC conv matching nn.Conv2d. w: (KH, KW, Cin, Cout)."""
    n, h, ww_, cin = x.shape
    kh, kw, _, cout = w.shape
    oh = (h + 2 * padding - dilation * (kh - 1) - 1) // stride + 1
    ow = (ww_ + 2 * padding - dilation * (kw - 1) - 1) // stride + 1

    xb = x.astype(jnp.bfloat16)                      # bf16 MXU inputs
    if kh == 1 and kw == 1 and padding == 0:
        # 1x1 conv: no im2col, pure (strided) reshape.
        if stride != 1:
            xb = xb[:, ::stride, ::stride, :]
        x2d = xb.reshape(n * oh * ow, cin)
    else:
        # TODO(synk): KxK convs still materialize an im2col matrix (in bf16 to
        # halve its HBM traffic); reading taps directly from the activation
        # inside the matmul kernel is not implemented.
        xp = jnp.pad(xb, ((0, 0), (padding, padding), (padding, padding), (0, 0)))
        patches = []
        for ih in range(kh):
            for iw in range(kw):
                h0, w0 = ih * dilation, iw * dilation
                sl = jax.lax.slice(
                    xp, (0, h0, w0, 0),
                    (n, h0 + (oh - 1) * stride + 1, w0 + (ow - 1) * stride + 1, cin),
                    (1, stride, stride, 1))
                patches.append(sl)
        x2d = jnp.concatenate(patches, axis=-1).reshape(n * oh * ow, kh * kw * cin)

    w2d = w.reshape(kh * kw * cin, cout).astype(jnp.bfloat16)
    if b is None:
        b = jnp.zeros((cout,), jnp.float32)
    out = matmul_bias(x2d, w2d, b)
    return out.reshape(n, oh, ow, cout)


# ---------------------------------------------------------------------------
# Plain-JAX glue: max-pool and bilinear (align_corners=True) interpolation
# ---------------------------------------------------------------------------

def maxpool_3x3_s2_p1(x):
    n, h, w, c = x.shape
    neg = jnp.finfo(x.dtype).min
    xp = jnp.pad(x, ((0, 0), (1, 1), (1, 1), (0, 0)), constant_values=neg)
    oh, ow = (h - 1) // 2 + 1, (w - 1) // 2 + 1
    out = None
    for ih in range(3):
        for iw in range(3):
            sl = jax.lax.slice(xp, (0, ih, iw, 0),
                               (n, ih + (oh - 1) * 2 + 1, iw + (ow - 1) * 2 + 1, c),
                               (1, 2, 2, 1))
            out = sl if out is None else jnp.maximum(out, sl)
    return out


def _interp_grid(in_size, out_size):
    if out_size == 1 or in_size == 1:
        src = jnp.zeros((out_size,), jnp.float32)
    else:
        src = jnp.arange(out_size, dtype=jnp.float32) * ((in_size - 1) / (out_size - 1))
    lo = jnp.clip(jnp.floor(src).astype(jnp.int32), 0, in_size - 1)
    hi = jnp.clip(lo + 1, 0, in_size - 1)
    return lo, hi, src - lo.astype(jnp.float32)


def bilinear_resize_align_corners(x, out_h, out_w):
    # TODO(synk): F.interpolate(bilinear, align_corners=True) done as JAX glue
    # (gather + lerp), not a dedicated Pallas kernel.
    h_lo, h_hi, h_t = _interp_grid(x.shape[1], out_h)
    w_lo, w_hi, w_t = _interp_grid(x.shape[2], out_w)
    top, bot = jnp.take(x, h_lo, axis=1), jnp.take(x, h_hi, axis=1)
    xh = top + (bot - top) * h_t[None, :, None, None]
    left, right = jnp.take(xh, w_lo, axis=2), jnp.take(xh, w_hi, axis=2)
    return left + (right - left) * w_t[None, None, :, None]


# ---------------------------------------------------------------------------
# Deterministic synthetic parameters
# ---------------------------------------------------------------------------

def _conv_params(key, kh, kw, cin, cout, bias):
    kw_key, kb_key = jax.random.split(key)
    fan_in = kh * kw * cin
    w = jax.random.normal(kw_key, (kh, kw, cin, cout), jnp.float32) * (2.0 / fan_in) ** 0.5
    b = jax.random.normal(kb_key, (cout,), jnp.float32) * 0.01 if bias else None
    return {"w": w, "b": b}


def _bn_params(c):
    return {"gamma": jnp.ones((c,), jnp.float32), "beta": jnp.zeros((c,), jnp.float32)}


def init_resnet101(key):
    keys = iter(jax.random.split(key, 512))
    params = {"conv1": _conv_params(next(keys), 7, 7, 3, 64, False),
              "bn1": _bn_params(64)}
    # (planes, blocks, stride, dilation) with output_stride = 16
    layer_cfg = [(64, 3, 1, 1), (128, 4, 2, 1), (256, 23, 2, 1), (512, 3, 1, 2)]
    inplanes = 64
    for li, (planes, blocks, stride, dilation) in enumerate(layer_cfg, start=1):
        blocks_p = []
        for bi in range(blocks):
            s = stride if bi == 0 else 1
            blk = {
                "conv1": _conv_params(next(keys), 1, 1, inplanes, planes, False),
                "bn1": _bn_params(planes),
                "conv2": _conv_params(next(keys), 3, 3, planes, planes, False),
                "bn2": _bn_params(planes),
                "conv3": _conv_params(next(keys), 1, 1, planes, planes * 4, False),
                "bn3": _bn_params(planes * 4),
                "stride": s,
                "dilation": dilation,
            }
            if bi == 0 and (s != 1 or inplanes != planes * 4):
                blk["down_conv"] = _conv_params(next(keys), 1, 1, inplanes, planes * 4, False)
                blk["down_bn"] = _bn_params(planes * 4)
            blocks_p.append(blk)
            inplanes = planes * 4
        params[f"layer{li}"] = blocks_p
    return params


def init_deeplabv3p(key, num_class=9):
    keys = iter(jax.random.split(key, 64))
    p = {"backbone": init_resnet101(next(keys))}
    p["aspp1"] = _conv_params(next(keys), 1, 1, 2048, 256, True)
    p["aspp1_bn"] = _bn_params(256)
    for i, rate in zip((2, 3, 4), (6, 12, 18)):
        p[f"aspp{i}"] = {"conv": _conv_params(next(keys), 3, 3, 2048, 256, True),
                         "bn": _bn_params(256), "rate": rate}
    p["gap_conv"] = _conv_params(next(keys), 1, 1, 2048, 256, True)
    p["gap_bn"] = _bn_params(256)
    p["conv1"] = _conv_params(next(keys), 1, 1, 1280, 256, True)
    p["bn1"] = _bn_params(256)
    p["conv2"] = _conv_params(next(keys), 1, 1, 256, 48, True)
    p["bn2"] = _bn_params(48)
    p["last_conv1"] = _conv_params(next(keys), 3, 3, 304, 256, True)
    p["last_bn1"] = _bn_params(256)
    p["last_conv2"] = _conv_params(next(keys), 3, 3, 256, 256, True)
    p["last_bn2"] = _bn_params(256)
    p["last_conv3"] = _conv_params(next(keys), 1, 1, 256, num_class, True)
    return p


# ---------------------------------------------------------------------------
# Forward pass
# ---------------------------------------------------------------------------

def bottleneck_forward(p, x):
    identity = x
    out = conv2d(x, p["conv1"]["w"])
    out = batchnorm2d(out, **p["bn1"], relu=True)
    out = conv2d(out, p["conv2"]["w"], stride=p["stride"],
                 padding=p["dilation"], dilation=p["dilation"])
    out = batchnorm2d(out, **p["bn2"], relu=True)
    out = conv2d(out, p["conv3"]["w"])
    if "down_conv" in p:
        identity = conv2d(x, p["down_conv"]["w"], stride=p["stride"])
        identity = batchnorm2d(identity, **p["down_bn"], relu=False)
    # bn3 + residual add + ReLU fused into one Pallas epilogue kernel.
    return batchnorm2d(out, **p["bn3"], residual=identity, relu=True)


def resnet_backbone_forward(p, x):
    x = conv2d(x, p["conv1"]["w"], stride=2, padding=3)
    x = batchnorm2d(x, **p["bn1"], relu=True)
    x = maxpool_3x3_s2_p1(x)
    for blk in p["layer1"]:
        x = bottleneck_forward(blk, x)
    low_feat = x
    for li in (2, 3, 4):
        for blk in p[f"layer{li}"]:
            x = bottleneck_forward(blk, x)
    return x, low_feat


def deeplabv3p_forward(p, x_nchw, output_stride=16):
    x = jnp.transpose(x_nchw, (0, 2, 3, 1))          # NCHW -> NHWC
    x, low = resnet_backbone_forward(p["backbone"], x)

    x1 = conv2d(x, p["aspp1"]["w"], p["aspp1"]["b"])
    x1 = batchnorm2d(x1, **p["aspp1_bn"])
    branches = [x1]
    for i in (2, 3, 4):
        ap = p[f"aspp{i}"]
        xi = conv2d(x, ap["conv"]["w"], ap["conv"]["b"],
                    padding=ap["rate"], dilation=ap["rate"])
        xi = batchnorm2d(xi, **ap["bn"])
        branches.append(xi)
    x5 = global_avg_pool(x)
    x5 = conv2d(x5, p["gap_conv"]["w"], p["gap_conv"]["b"])
    x5 = batchnorm2d(x5, **p["gap_bn"])
    x5 = bilinear_resize_align_corners(x5, branches[-1].shape[1], branches[-1].shape[2])
    branches.append(x5)
    x = jnp.concatenate(branches, axis=-1)           # -> 1280 channels

    x = conv2d(x, p["conv1"]["w"], p["conv1"]["b"])
    x = batchnorm2d(x, **p["bn1"])
    sf = output_stride // 4
    x = bilinear_resize_align_corners(x, x.shape[1] * sf, x.shape[2] * sf)

    low = conv2d(low, p["conv2"]["w"], p["conv2"]["b"])
    low = batchnorm2d(low, **p["bn2"])
    x = jnp.concatenate([x, low], axis=-1)           # -> 304 channels

    x = conv2d(x, p["last_conv1"]["w"], p["last_conv1"]["b"], padding=1)
    x = batchnorm2d(x, **p["last_bn1"])
    x = conv2d(x, p["last_conv2"]["w"], p["last_conv2"]["b"], padding=1)
    x = batchnorm2d(x, **p["last_bn2"])
    x = conv2d(x, p["last_conv3"]["w"], p["last_conv3"]["b"])
    sf2 = output_stride // (output_stride // 4)
    x = bilinear_resize_align_corners(x, x.shape[1] * sf2, x.shape[2] * sf2)
    return jnp.transpose(x, (0, 3, 1, 2))            # NHWC -> NCHW


if __name__ == "__main__":
    key = jax.random.PRNGKey(0)
    pkey, xkey = jax.random.split(key)
    params = init_deeplabv3p(pkey, num_class=9)
    x = jax.random.normal(xkey, (2, 3, 64, 64), jnp.float32)   # NCHW like PyTorch
    out = deeplabv3p_forward(params, x, output_stride=16)
    out = jax.block_until_ready(out)
    assert out.shape == (2, 9, 64, 64), out.shape
    assert bool(jnp.all(jnp.isfinite(out)))
    print("KERNEL_OK")
</pallas_src>

<mosaic_0001>
module attributes {stable_mosaic.version = 11 : i64} {
  func.func @_matmul_bias_kernel(%arg0: i32, %arg1: i32, %arg2: i32, %arg3: memref<256x256xbf16, #tpu.memory_space<vmem>>, %arg4: memref<256x128xbf16, #tpu.memory_space<vmem>>, %arg5: memref<1x128xf32, #tpu.memory_space<vmem>>, %arg6: memref<256x128xf32, #tpu.memory_space<vmem>>) attributes {dimension_semantics = [#tpu.dimension_semantics<parallel>, #tpu.dimension_semantics<parallel>, #tpu.dimension_semantics<arbitrary>], iteration_bounds = array<i64: 8, 1, 1>, scalar_prefetch = 0 : i64, scratch_operands = 0 : i64, tpu.core_type = #tpu.core_type<tc>, window_params = [{transform_indices = @transform_0, window_bounds = array<i64: 256, 256>}, {transform_indices = @transform_1, window_bounds = array<i64: 256, 128>}, {transform_indices = @transform_2, window_bounds = array<i64: 1, 128>}, {transform_indices = @transform_3, window_bounds = array<i64: 256, 128>}]} {
    %c0_i32 = arith.constant 0 : i32
    %0 = arith.cmpi eq, %arg2, %c0_i32 : i32
    %1 = arith.extui %0 : i1 to i32
    %c0_i32_0 = arith.constant 0 : i32
    %2 = arith.cmpi ne, %1, %c0_i32_0 : i32
    scf.if %2 {
      %c0_8 = arith.constant 0 : index
      %c0_9 = arith.constant 0 : index
      %9 = vector.load %arg5[%c0_8, %c0_9] : memref<1x128xf32, #tpu.memory_space<vmem>>, vector<1x128xf32>
      %10 = vector.shape_cast %9 : vector<1x128xf32> to vector<1x128xf32>
      %11 = vector.broadcast %10 : vector<1x128xf32> to vector<256x128xf32>
      %c0_10 = arith.constant 0 : index
      %c0_11 = arith.constant 0 : index
      %12 = vector.load %arg6[%c0_10, %c0_11] : memref<256x128xf32, #tpu.memory_space<vmem>>, vector<256x128xf32>
      tpu.vector_store %arg6[%c0_10, %c0_11], %11 {strides = array<i32>} : memref<256x128xf32, #tpu.memory_space<vmem>>, vector<256x128xf32>,
    } else {
    }
    %c0 = arith.constant 0 : index
    %c0_1 = arith.constant 0 : index
    %3 = vector.load %arg6[%c0, %c0_1] : memref<256x128xf32, #tpu.memory_space<vmem>>, vector<256x128xf32>
    %c0_2 = arith.constant 0 : index
    %c0_3 = arith.constant 0 : index
    %4 = vector.load %arg3[%c0_2, %c0_3] : memref<256x256xbf16, #tpu.memory_space<vmem>>, vector<256x256xbf16>
    %c0_4 = arith.constant 0 : index
    %c0_5 = arith.constant 0 : index
    %5 = vector.load %arg4[%c0_4, %c0_5] : memref<256x128xbf16, #tpu.memory_space<vmem>>, vector<256x128xbf16>
    %cst = arith.constant dense<0.000000e+00> : vector<256x128xf32>
    %6 = tpu.matmul %4, %5, %cst {dimension_numbers = #tpu.dot_dimension_numbers<[1], [0], [0], [1], [0, 0, 1, 1], [], []>} : vector<256x256xbf16>, vector<256x128xbf16>, vector<256x128xf32> -> vector<256x128xf32>
    %7 = arith.addf %3, %6 : vector<256x128xf32>
    %c0_6 = arith.constant 0 : index
    %c0_7 = arith.constant 0 : index
    %8 = vector.load %arg6[%c0_6, %c0_7] : memref<256x128xf32, #tpu.memory_space<vmem>>, vector<256x128xf32>
    tpu.vector_store %arg6[%c0_6, %c0_7], %7 {strides = array<i32>} : memref<256x128xf32, #tpu.memory_space<vmem>>, vector<256x128xf32>,
    return
  }
  func.func @transform_0(%arg0: i32, %arg1: i32, %arg2: i32) -> (i32, i32) {
    %c0_i32 = arith.constant 0 : i32
    return %arg0, %arg2 : i32, i32
  }
  func.func @transform_1(%arg0: i32, %arg1: i32, %arg2: i32) -> (i32, i32) {
    %c0_i32 = arith.constant 0 : i32
    return %arg2, %arg1 : i32, i32
  }
  func.func @transform_2(%arg0: i32, %arg1: i32, %arg2: i32) -> (i32, i32) {
    %c0_i32 = arith.constant 0 : i32
    %c0_i32_0 = arith.constant 0 : i32
    return %c0_i32, %arg1 : i32, i32
  }
  func.func @transform_3(%arg0: i32, %arg1: i32, %arg2: i32) -> (i32, i32) {
    %c0_i32 = arith.constant 0 : i32
    return %arg0, %arg1 : i32, i32
  }
}

</mosaic_0001>

<bundles_post_ra>
// kernel: conv2d.1
= control target key start
LH: loop header
LB: loop body
LE: loop exit
PB: predicated region body
PF: predicated region fallthrough
CT: control target
= control target key end

     0   :  { %8 = vsyncpa [#allocation3], 0  ;;  %s1697_s0 = inlined_call_operand.vmem [shape: bf16[2048,256], index: 0, kind: input, shape index: {}]   ;;  %s1698_s1 = inlined_call_operand.vmem [shape: bf16[256,128], index: 1, kind: input, shape index: {}]   ;;  %s1699_s2 = inlined_call_operand.vmem [shape: f32[1,128], index: 2, kind: input, shape index: {}]   ;;  %s1700_s3 = inlined_call_operand.hbm [shape: f32[2048,128], index: 3, kind: output, shape index: {}]  }
   0x1   :  { %10 = vsyncpa [#allocation3 + $0x1], 0  ;;  %s1425_s12 = smov 0   ;;  %s1427_s13 = smov 0  }
   0x2   :  { %s1429_s14 = smov 0   ;;  %s1431_s15 = smov 0  }
   0x3   :  { %s1433_s16 = smov 0   ;;  %s1435_s17 = smov 0  }
   0x4 LB: > { %s1006_s18 = sadd.s32 4294967295, %s1400_s17   ;;  %s1007_s19 = sadd.s32 4294967294, %s1400_s17   ;;  %s1400_s17 = sphi %s1435_s17, %s16_s17   ;;  %s1396_s16 = sphi %s1433_s16, %s1707_s16   ;;  %s1392_s15 = sphi %s1431_s15, %s1706_s15   ;;  %s1388_s14 = sphi %s1429_s14, %s1705_s14   ;;  %s1384_s13 = sphi %s1427_s13, %s1704_s13   ;;  %s1380_s12 = sphi %s1425_s12, %s1703_s12  }
   0x5   : > { %s35_s20 = sadd.s32 1, %s1396_s16  ;;  %s126_s21 = sadd.s32 1, %s1388_s14 }
   0x6   : > { %p37_p0 = scmp.ge.s32.totalorder %s35_s20, 8  ;;  %p136_p1 = scmp.ne.s32.totalorder %s1388_s14, %s1384_s13 }
   0x7   : > { %p137_p2 = scmp.eq.s32.totalorder %s1006_s18, 7  ;;  %p142_p3 = scmp.ne.s32.totalorder %s1384_s13, %s1380_s12 }
   0x8   : > { %s1709_s20 = smov (%p37_p0, %s35_s20), 0  ;;  %p143_p5 = scmp.eq.s32.totalorder %s1007_s19, 7 }
   0x9   : > { %p1465_p4 = por %p137_p2, %p136_p1  ;;  %s121_s23 = ssub.s32 %s1396_s16, %s1709_s20 }
   0xa   : > { %p1012_p6 = scmp.ge.s32.totalorder %s1400_s17, 1  ;;  %p124_p7 = scmp.eq.s32.totalorder %s121_s23, 0 }
   0xb   : > { %p1472_p8 = por %p143_p5, %p142_p3  ;;  %p194_p9 = scmp.lt.s32.totalorder %s1400_s17, 9 }
   0xc   : > { %s1478_s25 = scalar_select %p124_p7, %s1388_s14, %s126_s21  }
   0xd   : > { %p195_p10 = pnand %p1012_p6, %p194_p9 }
   0xe   : > { %v1258_v0 = vld [vmem:[%s1698_s1 + $0x40] sm:$0xff] (!%p195_p10)   ;;  %s1014_s28 = sshll.u32 (!%p195_p10), %s1392_s15, 5  ;;  %v1260_v2 = vld [vmem:[%s1698_s1 + $0x48] sm:$0xff] (!%p195_p10)   ;;  %v1262_v4 = vld [vmem:[%s1698_s1 + $0x50] sm:$0xff] (!%p195_p10)   ;;  %s231_s30 = sand.u32 (!%p195_p10), 1, %s1384_s13  }
   0xf   : > { %198 = sbr.rel (%p195_p10) target bundleno = 337 (0x151), region = 32  ;;  %v1259_v1 = vld [vmem:[%s1698_s1] sm:$0xff] (!%p195_p10)   ;;  %1073 = vmatprep.subr.bf16.mxu0 (!%p195_p10), %v1258_v0  ;;  %1185 = vmatprep.subr.bf16.mxu1 (!%p195_p10), %v1258_v0  ;;  %v1261_v3 = vld [vmem:[%s1698_s1 + $0x8] sm:$0xff] (!%p195_p10)   ;;  %p236_p11 = scmp.lt.s32.totalorder (!%p195_p10), %s1014_s28, 255  ;;  %v1263_v5 = vld [vmem:[%s1698_s1 + $0x10] sm:$0xff] (!%p195_p10)  }
  0x10   : > { %1074 = vmatpush3.bf16.msra.mxu0 (!%p195_p10), %v1259_v1  ;;  %1193 = vmatpush3.bf16.msra.mxu1 (!%p195_p10), %v1259_v1  ;;  %v1264_v6 = vld [vmem:[%s1698_s1 + $0x58] sm:$0xff] (!%p195_p10)   ;;  %v1266_v8 = vld [vmem:[%s1698_s1 + $0x60] sm:$0xff] (!%p195_p10)   ;;  %v1268_v10 = vld [vmem:[%s1698_s1 + $0x68] sm:$0xff] (!%p195_p10)   ;;  %s1013_s4 = sshll.u32 (!%p195_p10), %s231_s30, 8  ;;  %s1402_s19 = smov (!%p195_p10), [#allocation2]  }
  0x11   : > { %1075 = vmatprep.subr.bf16.mxu0 (!%p195_p10), %v1260_v2  ;;  %1186 = vmatprep.subr.bf16.mxu1 (!%p195_p10), %v1260_v2  ;;  %v1265_v7 = vld [vmem:[%s1698_s1 + $0x18] sm:$0xff] (!%p195_p10)   ;;  %v1267_v9 = vld [vmem:[%s1698_s1 + $0x20] sm:$0xff] (!%p195_p10)   ;;  %v1269_v13 = vld [vmem:[%s1698_s1 + $0x28] sm:$0xff] (!%p195_p10)   ;;  %s1326_s21 = sshll.u32 (!%p195_p10), %s1402_s19, 4  ;;  %s1327_s21 = int_to_ptr.vmem [resolvable:$false] %s1326_s21 }
  0x12   : > { %v1270_v14 = vld [vmem:[%s1698_s1 + $0x70] sm:$0xff] (!%p195_p10)   ;;  %v1272_v16 = vld [vmem:[%s1698_s1 + $0x78] sm:$0xff] (!%p195_p10)   ;;  %v1572_v50 = vld [vmem:[%s1699_s2] ss:$0 sm:$0xff] (!%p195_p10)  ;;  %s1328_s23 = scalar_lea.vmem (!%p195_p10), %s1327_s21, 8192 }
  0x13   : > { %v1271_v15 = vld [vmem:[%s1698_s1 + $0x30] sm:$0xff] (!%p195_p10)   ;;  %v1273_v17 = vld [vmem:[%s1698_s1 + $0x38] sm:$0xff] (!%p195_p10)  }
  0x14   : > { %1076 = vmatpush3.bf16.msra.mxu0 (!%p195_p10), %v1261_v3  ;;  %1194 = vmatpush3.bf16.msra.mxu1 (!%p195_p10), %v1261_v3 }
  0x15   : > { %1077 = vmatprep.subr.bf16.mxu0 (!%p195_p10), %v1262_v4  ;;  %1187 = vmatprep.subr.bf16.mxu1 (!%p195_p10), %v1262_v4 }
  0x16   : > { %s1711_s28 = smov (!%p236_p11, %s1014_s28), 255 }
  0x17   : > { %s1071_s26 = sshll.u32 %s1711_s28, 3  ;;  %s1072_s28 = sshll.u32 %s1392_s15, 12 }
  0x18   : > { %1078 = vmatpush3.bf16.msra.mxu0 %v1263_v5  ;;  %1195 = vmatpush3.bf16.msra.mxu1 %v1263_v5  ;;  %s1511_s5 = scalar_lea.vmem %s1697_s0, %s1071_s26  ;;  %s1639_s11 = scalar_lea.hbm %s1700_s3, %s1072_s28 }
  0x19   : > { %1079 = vmatprep.subr.bf16.mxu0 %v1264_v6  ;;  %1188 = vmatprep.subr.bf16.mxu1 %v1264_v6  ;;  %v1276_v11 = vld [vmem:[%s1511_s5 + $0x4] ss:$8 sps:$4 sm:$0xff]   ;;  %v1274_v18 = vld [vmem:[%s1511_s5] ss:$8 sps:$4 sm:$0xff]   ;;  %v1280_v20 = vld [vmem:[%s1511_s5 + $0x14] ss:$8 sps:$4 sm:$0xff]  }
  0x1a   : > { %v1279_v12 = vld [vmem:[%s1511_s5 + $0x84] ss:$8 sps:$4 sm:$0xff]   ;;  %687 = vmatprep.mubr.bf16.mxu0 %v1276_v11  ;;  %v1277_v19 = vld [vmem:[%s1511_s5 + $0x80] ss:$8 sps:$4 sm:$0xff]   ;;  %v1282_v21 = vld [vmem:[%s1511_s5 + $0x94] ss:$8 sps:$4 sm:$0xff]  }
  0x1b   : > { %751 = vmatprep.mubr.bf16.mxu1 %v1279_v12  ;;  %v1284_v22 = vld [vmem:[%s1511_s5 + $0x10] ss:$8 sps:$4 sm:$0xff]   ;;  %v1286_v24 = vld [vmem:[%s1511_s5 + $0x24] ss:$8 sps:$4 sm:$0xff]   ;;  %v1290_v26 = vld [vmem:[%s1511_s5 + $0x20] ss:$8 sps:$4 sm:$0xff]  }
  0x1c   : > { %1080 = vmatpush3.bf16.msra.mxu0 %v1265_v7  ;;  %1196 = vmatpush3.bf16.msra.mxu1 %v1265_v7  ;;  %v1285_v23 = vld [vmem:[%s1511_s5 + $0x90] ss:$8 sps:$4 sm:$0xff]   ;;  %v1288_v25 = vld [vmem:[%s1511_s5 + $0xa4] ss:$8 sps:$4 sm:$0xff]   ;;  %v1291_v27 = vld [vmem:[%s1511_s5 + $0xa0] ss:$8 sps:$4 sm:$0xff]  }
  0x1d   : > { %1081 = vmatprep.subr.bf16.mxu0 %v1266_v8  ;;  %1189 = vmatprep.subr.bf16.mxu1 %v1266_v8  ;;  %v1292_v28 = vld [vmem:[%s1511_s5 + $0x34] ss:$8 sps:$4 sm:$0xff]   ;;  %v1296_v30 = vld [vmem:[%s1511_s5 + $0x30] ss:$8 sps:$4 sm:$0xff]   ;;  %v1298_v32 = vld [vmem:[%s1511_s5 + $0x44] ss:$8 sps:$4 sm:$0xff]  }
  0x1e   : > { %v1294_v29 = vld [vmem:[%s1511_s5 + $0xb4] ss:$8 sps:$4 sm:$0xff]   ;;  %v1297_v31 = vld [vmem:[%s1511_s5 + $0xb0] ss:$8 sps:$4 sm:$0xff]   ;;  %v1300_v33 = vld [vmem:[%s1511_s5 + $0xc4] ss:$8 sps:$4 sm:$0xff]  }
  0x1f   : > { %v1302_v34 = vld [vmem:[%s1511_s5 + $0x40] ss:$8 sps:$4 sm:$0xff]   ;;  %v1304_v36 = vld [vmem:[%s1511_s5 + $0x54] ss:$8 sps:$4 sm:$0xff]   ;;  %v1308_v38 = vld [vmem:[%s1511_s5 + $0x50] ss:$8 sps:$4 sm:$0xff]  }
  0x20   : > { %1082 = vmatpush3.bf16.msra.mxu0 %v1267_v9  ;;  %1197 = vmatpush3.bf16.msra.mxu1 %v1267_v9  ;;  %v1303_v35 = vld [vmem:[%s1511_s5 + $0xc0] ss:$8 sps:$4 sm:$0xff]   ;;  %v1306_v37 = vld [vmem:[%s1511_s5 + $0xd4] ss:$8 sps:$4 sm:$0xff]   ;;  %v1309_v39 = vld [vmem:[%s1511_s5 + $0xd0] ss:$8 sps:$4 sm:$0xff]  }
  0x21   : > { %1083 = vmatprep.subr.bf16.mxu0 %v1268_v10  ;;  %1190 = vmatprep.subr.bf16.mxu1 %v1268_v10  ;;  %v1310_v40 = vld [vmem:[%s1511_s5 + $0x64] ss:$8 sps:$4 sm:$0xff]   ;;  %v1314_v42 = vld [vmem:[%s1511_s5 + $0x60] ss:$8 sps:$4 sm:$0xff]   ;;  %v1316_v44 = vld [vmem:[%s1511_s5 + $0x74] ss:$8 sps:$4 sm:$0xff]  }
  0x22   : > { %v1312_v41 = vld [vmem:[%s1511_s5 + $0xe4] ss:$8 sps:$4 sm:$0xff]   ;;  %v1315_v43 = vld [vmem:[%s1511_s5 + $0xe0] ss:$8 sps:$4 sm:$0xff]   ;;  %v1318_v45 = vld [vmem:[%s1511_s5 + $0xf4] ss:$8 sps:$4 sm:$0xff]  }
  0x23   : > { %v1320_v46 = vld [vmem:[%s1511_s5 + $0x70] ss:$8 sps:$4 sm:$0xff]   ;;  %s1651_s15 = scalar_lea.sflag [#allocation3], %s231_s30 }
  0x24   : > { %1084 = vmatpush3.bf16.msra.mxu0 %v1269_v13  ;;  %1198 = vmatpush3.bf16.msra.mxu1 %v1269_v13  ;;  %v1321_v47 = vld [vmem:[%s1511_s5 + $0xf0] ss:$8 sps:$4 sm:$0xff]   ;;  %s1576_s5 = scalar_lea.vmem [#allocation2], %s1013_s4 }
  0x25   : > { %1085 = vmatprep.subr.bf16.mxu0 %v1270_v14  ;;  %1191 = vmatprep.subr.bf16.mxu1 %v1270_v14  ;;  %s895_s8 = sshll.u32 %s1576_s5, 4  ;;  %s1641_s8 = int_to_ptr.vmem [resolvable:$true] %s895_s8 }
  0x26   : > { %s1322_s18 = scalar_lea.vmem %s1641_s8, 4096  ;;  %p1329_p1 = scmp.lt.s32.totalorder %s1641_s8, %s1327_s21 }
  0x27   : > { %p1323_p12 = scmp.ne.s32.totalorder %s1641_s8, %s1322_s18  ;;  %p1330_p2 = scmp.lt.s32.totalorder %s1328_s23, %s1322_s18 }
  0x28   : > { %1086 = vmatpush3.bf16.msra.mxu0 %v1271_v15  ;;  %1199 = vmatpush3.bf16.msra.mxu1 %v1271_v15 }
  0x29   : > { %1087 = vmatprep.subr.bf16.mxu0 %v1272_v16  ;;  %1192 = vmatprep.subr.bf16.mxu1 %v1272_v16  ;;  %p1324_p13 = pnand %p1323_p12, %p1465_p4  ;;  %p1331_p3 = por %p1330_p2, %p1329_p1 }
  0x2b   : > { %p1325_p0 = pneg %p1324_p13 }
  0x2c   : > { %1088 = vmatpush3.bf16.msra.mxu0 %v1273_v17  ;;  %1200 = vmatpush3.bf16.msra.mxu1 %v1273_v17 }
  0x2d   : > { %p1332_p5 = pnand %p1331_p3, %p1325_p0 }
  0x2f   : > { %688 = vmatmul.mubr.bf16.vlgmr.msra.gmra.mrb[0].mxu0 %v1274_v18  ;;  %752 = vmatmul.mubr.bf16.vlgmr.msra.gmra.mrb[0].mxu1 %v1277_v19 }
  0x30   : > { %695 = vmatprep.mubr.bf16.mxu0 %v1280_v20  ;;  %759 = vmatprep.mubr.bf16.mxu1 %v1282_v21 }
  0x37   : > { %696 = vmatmul.mubr.bf16.gmra.mrb[4].mxu0 %v1284_v22  ;;  %760 = vmatmul.mubr.bf16.gmra.mrb[4].mxu1 %v1285_v23 }
  0x38   : > { %703 = vmatprep.mubr.bf16.mxu0 %v1286_v24  ;;  %767 = vmatprep.mubr.bf16.mxu1 %v1288_v25 }
  0x3f   : > { %704 = vmatmul.mubr.bf16.gmra.mrb[8].mxu0 %v1290_v26  ;;  %768 = vmatmul.mubr.bf16.gmra.mrb[8].mxu1 %v1291_v27 }
  0x40   : > { %711 = vmatprep.mubr.bf16.mxu0 %v1292_v28  ;;  %775 = vmatprep.mubr.bf16.mxu1 %v1294_v29 }
  0x47   : > { %712 = vmatmul.mubr.bf16.gmra.mrb[12].mxu0 %v1296_v30  ;;  %776 = vmatmul.mubr.bf16.gmra.mrb[12].mxu1 %v1297_v31 }
  0x48   : > { %719 = vmatprep.mubr.bf16.mxu0 %v1298_v32  ;;  %783 = vmatprep.mubr.bf16.mxu1 %v1300_v33 }
  0x4f   : > { %720 = vmatmul.mubr.bf16.gmra.mrb[16].mxu0 %v1302_v34  ;;  %784 = vmatmul.mubr.bf16.gmra.mrb[16].mxu1 %v1303_v35 }
  0x50   : > { %727 = vmatprep.mubr.bf16.mxu0 %v1304_v36  ;;  %791 = vmatprep.mubr.bf16.mxu1 %v1306_v37 }
  0x57   : > { %728 = vmatmul.mubr.bf16.gmra.mrb[20].mxu0 %v1308_v38  ;;  %792 = vmatmul.mubr.bf16.gmra.mrb[20].mxu1 %v1309_v39 }
  0x58   : > { %735 = vmatprep.mubr.bf16.mxu0 %v1310_v40  ;;  %799 = vmatprep.mubr.bf16.mxu1 %v1312_v41 }
  0x5f   : > { %736 = vmatmul.mubr.bf16.gmra.mrb[24].mxu0 %v1314_v42  ;;  %800 = vmatmul.mubr.bf16.gmra.mrb[24].mxu1 %v1315_v43 }
  0x60   : > { %743 = vmatprep.mubr.bf16.mxu0 %v1316_v44  ;;  %807 = vmatprep.mubr.bf16.mxu1 %v1318_v45 }
  0x67   : > { %744 = vmatmul.mubr.bf16.gmra.mrb[28].mxu0 %v1320_v46  ;;  %808 = vmatmul.mubr.bf16.gmra.mrb[28].mxu1 %v1321_v47 }
 0x102   : > { %v1089_v48 = vpop.f32.mrb[0].mxu0  ;;  %v1137_v49 = vpop.f32.mrb[0].mxu1 }
 0x103   : > { %v1090_v51 = vpop.f32.mrb[1].mxu0  ;;  %v1138_v52 = vpop.f32.mrb[1].mxu1 }
 0x104   : > { %v1091_v53 = vadd.f32 %v1090_v51, %v1089_v48  ;;  %v1139_v54 = vadd.f32 %v1138_v52, %v1137_v49  ;;  %v1092_v55 = vpop.f32.mrb[2].mxu0  ;;  %v1140_v56 = vpop.f32.mrb[2].mxu1 }
 0x105   : > { %v1093_v57 = vpop.f32.mrb[3].mxu0  ;;  %v1141_v58 = vpop.f32.mrb[3].mxu1 }
 0x106   : > { %v816_v59 = vadd.f32 %v1091_v53, %v1572_v50  ;;  %v832_v60 = vadd.f32 %v1139_v54, %v1572_v50  ;;  %v1094_v61 = vadd.f32 %v1093_v57, %v1092_v55  ;;  %v1142_v62 = vadd.f32 %v1141_v58, %v1140_v56 }
 0x108   : > { %848 = vst [vmem:[%s1576_s5] sm:$0xff] %v816_v59  ;;  %864 = vst [vmem:[%s1576_s5 + $0x80] sm:$0xff] %v832_v60  ;;  %v817_v63 = vadd.f32 %v1094_v61, %v1572_v50  ;;  %v833_v0 = vadd.f32 %v1142_v62, %v1572_v50 }
 0x10a   : > { %849 = vst [vmem:[%s1576_s5 + $0x8] sm:$0xff] %v817_v63  ;;  %865 = vst [vmem:[%s1576_s5 + $0x88] sm:$0xff] %v833_v0  ;;  %v1095_v1 = vpop.f32.mrb[4].mxu0  ;;  %v1143_v2 = vpop.f32.mrb[4].mxu1 }
 0x10b   : > { %v1096_v3 = vpop.f32.mrb[5].mxu0  ;;  %v1144_v4 = vpop.f32.mrb[5].mxu1 }
 0x10c   : > { %v1097_v5 = vadd.f32 %v1096_v3, %v1095_v1  ;;  %v1145_v6 = vadd.f32 %v1144_v4, %v1143_v2  ;;  %v1098_v7 = vpop.f32.mrb[6].mxu0  ;;  %v1146_v8 = vpop.f32.mrb[6].mxu1 }
 0x10d   : > { %v1099_v9 = vpop.f32.mrb[7].mxu0  ;;  %v1147_v10 = vpop.f32.mrb[7].mxu1 }
 0x10e   : > { %v818_v11 = vadd.f32 %v1097_v5, %v1572_v50  ;;  %v834_v12 = vadd.f32 %v1145_v6, %v1572_v50  ;;  %v1100_v13 = vadd.f32 %v1099_v9, %v1098_v7  ;;  %v1148_v14 = vadd.f32 %v1147_v10, %v1146_v8 }
 0x110   : > { %850 = vst [vmem:[%s1576_s5 + $0x10] sm:$0xff] %v818_v11  ;;  %866 = vst [vmem:[%s1576_s5 + $0x90] sm:$0xff] %v834_v12  ;;  %v819_v15 = vadd.f32 %v1100_v13, %v1572_v50  ;;  %v835_v16 = vadd.f32 %v1148_v14, %v1572_v50 }
 0x112   : > { %851 = vst [vmem:[%s1576_s5 + $0x18] sm:$0xff] %v819_v15  ;;  %867 = vst [vmem:[%s1576_s5 + $0x98] sm:$0xff] %v835_v16  ;;  %v1101_v17 = vpop.f32.mrb[8].mxu0  ;;  %v1149_v18 = vpop.f32.mrb[8].mxu1 }
 0x113   : > { %v1102_v19 = vpop.f32.mrb[9].mxu0  ;;  %v1150_v20 = vpop.f32.mrb[9].mxu1 }
 0x114   : > { %v1103_v21 = vadd.f32 %v1102_v19, %v1101_v17  ;;  %v1151_v22 = vadd.f32 %v1150_v20, %v1149_v18  ;;  %v1104_v23 = vpop.f32.mrb[10].mxu0  ;;  %v1152_v24 = vpop.f32.mrb[10].mxu1 }
 0x115   : > { %v1105_v25 = vpop.f32.mrb[11].mxu0  ;;  %v1153_v26 = vpop.f32.mrb[11].mxu1 }
 0x116   : > { %v820_v27 = vadd.f32 %v1103_v21, %v1572_v50  ;;  %v836_v28 = vadd.f32 %v1151_v22, %v1572_v50  ;;  %v1106_v29 = vadd.f32 %v1105_v25, %v1104_v23  ;;  %v1154_v30 = vadd.f32 %v1153_v26, %v1152_v24 }
 0x118   : > { %852 = vst [vmem:[%s1576_s5 + $0x20] sm:$0xff] %v820_v27  ;;  %868 = vst [vmem:[%s1576_s5 + $0xa0] sm:$0xff] %v836_v28  ;;  %v821_v31 = vadd.f32 %v1106_v29, %v1572_v50  ;;  %v837_v32 = vadd.f32 %v1154_v30, %v1572_v50 }
 0x11a   : > { %853 = vst [vmem:[%s1576_s5 + $0x28] sm:$0xff] %v821_v31  ;;  %869 = vst [vmem:[%s1576_s5 + $0xa8] sm:$0xff] %v837_v32  ;;  %v1107_v33 = vpop.f32.mrb[12].mxu0  ;;  %v1155_v34 = vpop.f32.mrb[12].mxu1 }
 0x11b   : > { %v1108_v35 = vpop.f32.mrb[13].mxu0  ;;  %v1156_v36 = vpop.f32.mrb[13].mxu1 }
 0x11c   : > { %v1109_v37 = vadd.f32 %v1108_v35, %v1107_v33  ;;  %v1157_v38 = vadd.f32 %v1156_v36, %v1155_v34  ;;  %v1110_v39 = vpop.f32.mrb[14].mxu0  ;;  %v1158_v40 = vpop.f32.mrb[14].mxu1 }
 0x11d   : > { %v1111_v41 = vpop.f32.mrb[15].mxu0  ;;  %v1159_v42 = vpop.f32.mrb[15].mxu1 }
 0x11e   : > { %v822_v43 = vadd.f32 %v1109_v37, %v1572_v50  ;;  %v838_v44 = vadd.f32 %v1157_v38, %v1572_v50  ;;  %v1112_v45 = vadd.f32 %v1111_v41, %v1110_v39  ;;  %v1160_v46 = vadd.f32 %v1159_v42, %v1158_v40 }
 0x120   : > { %854 = vst [vmem:[%s1576_s5 + $0x30] sm:$0xff] %v822_v43  ;;  %870 = vst [vmem:[%s1576_s5 + $0xb0] sm:$0xff] %v838_v44  ;;  %v823_v47 = vadd.f32 %v1112_v45, %v1572_v50  ;;  %v839_v48 = vadd.f32 %v1160_v46, %v1572_v50 }
 0x122   : > { %855 = vst [vmem:[%s1576_s5 + $0x38] sm:$0xff] %v823_v47  ;;  %871 = vst [vmem:[%s1576_s5 + $0xb8] sm:$0xff] %v839_v48  ;;  %v1113_v49 = vpop.f32.mrb[16].mxu0  ;;  %v1161_v51 = vpop.f32.mrb[16].mxu1 }
 0x123   : > { %v1114_v52 = vpop.f32.mrb[17].mxu0  ;;  %v1162_v53 = vpop.f32.mrb[17].mxu1 }
 0x124   : > { %v1115_v54 = vadd.f32 %v1114_v52, %v1113_v49  ;;  %v1163_v55 = vadd.f32 %v1162_v53, %v1161_v51  ;;  %v1116_v56 = vpop.f32.mrb[18].mxu0  ;;  %v1164_v57 = vpop.f32.mrb[18].mxu1 }
 0x125   : > { %v1117_v58 = vpop.f32.mrb[19].mxu0  ;;  %v1165_v59 = vpop.f32.mrb[19].mxu1 }
 0x126   : > { %v824_v60 = vadd.f32 %v1115_v54, %v1572_v50  ;;  %v840_v61 = vadd.f32 %v1163_v55, %v1572_v50  ;;  %v1118_v62 = vadd.f32 %v1117_v58, %v1116_v56  ;;  %v1166_v63 = vadd.f32 %v1165_v59, %v1164_v57 }
 0x128   : > { %856 = vst [vmem:[%s1576_s5 + $0x40] sm:$0xff] %v824_v60  ;;  %872 = vst [vmem:[%s1576_s5 + $0xc0] sm:$0xff] %v840_v61  ;;  %v825_v0 = vadd.f32 %v1118_v62, %v1572_v50  ;;  %v841_v1 = vadd.f32 %v1166_v63, %v1572_v50 }
 0x12a   : > { %857 = vst [vmem:[%s1576_s5 + $0x48] sm:$0xff] %v825_v0  ;;  %873 = vst [vmem:[%s1576_s5 + $0xc8] sm:$0xff] %v841_v1  ;;  %v1119_v2 = vpop.f32.mrb[20].mxu0  ;;  %v1167_v3 = vpop.f32.mrb[20].mxu1 }
 0x12b   : > { %v1120_v4 = vpop.f32.mrb[21].mxu0  ;;  %v1168_v5 = vpop.f32.mrb[21].mxu1 }
 0x12c   : > { %v1121_v6 = vadd.f32 %v1120_v4, %v1119_v2  ;;  %v1169_v7 = vadd.f32 %v1168_v5, %v1167_v3  ;;  %v1122_v8 = vpop.f32.mrb[22].mxu0  ;;  %v1170_v9 = vpop.f32.mrb[22].mxu1 }
 0x12d   : > { %v1123_v10 = vpop.f32.mrb[23].mxu0  ;;  %v1171_v11 = vpop.f32.mrb[23].mxu1 }
 0x12e   : > { %v826_v12 = vadd.f32 %v1121_v6, %v1572_v50  ;;  %v842_v13 = vadd.f32 %v1169_v7, %v1572_v50  ;;  %v1124_v14 = vadd.f32 %v1123_v10, %v1122_v8  ;;  %v1172_v15 = vadd.f32 %v1171_v11, %v1170_v9 }
 0x130   : > { %858 = vst [vmem:[%s1576_s5 + $0x50] sm:$0xff] %v826_v12  ;;  %874 = vst [vmem:[%s1576_s5 + $0xd0] sm:$0xff] %v842_v13  ;;  %v827_v16 = vadd.f32 %v1124_v14, %v1572_v50  ;;  %v843_v17 = vadd.f32 %v1172_v15, %v1572_v50 }
 0x132   : > { %859 = vst [vmem:[%s1576_s5 + $0x58] sm:$0xff] %v827_v16  ;;  %875 = vst [vmem:[%s1576_s5 + $0xd8] sm:$0xff] %v843_v17  ;;  %v1125_v18 = vpop.f32.mrb[24].mxu0  ;;  %v1173_v19 = vpop.f32.mrb[24].mxu1 }
 0x133   : > { %v1126_v20 = vpop.f32.mrb[25].mxu0  ;;  %v1174_v21 = vpop.f32.mrb[25].mxu1 }
 0x134   : > { %v1127_v22 = vadd.f32 %v1126_v20, %v1125_v18  ;;  %v1175_v23 = vadd.f32 %v1174_v21, %v1173_v19  ;;  %v1128_v24 = vpop.f32.mrb[26].mxu0  ;;  %v1176_v25 = vpop.f32.mrb[26].mxu1 }
 0x135   : > { %v1129_v26 = vpop.f32.mrb[27].mxu0  ;;  %v1177_v27 = vpop.f32.mrb[27].mxu1 }
 0x136   : > { %v828_v28 = vadd.f32 %v1127_v22, %v1572_v50  ;;  %v844_v29 = vadd.f32 %v1175_v23, %v1572_v50  ;;  %v1130_v30 = vadd.f32 %v1129_v26, %v1128_v24  ;;  %v1178_v31 = vadd.f32 %v1177_v27, %v1176_v25 }
 0x138   : > { %860 = vst [vmem:[%s1576_s5 + $0x60] sm:$0xff] %v828_v28  ;;  %876 = vst [vmem:[%s1576_s5 + $0xe0] sm:$0xff] %v844_v29  ;;  %v829_v32 = vadd.f32 %v1130_v30, %v1572_v50  ;;  %v845_v33 = vadd.f32 %v1178_v31, %v1572_v50 }
 0x13a   : > { %861 = vst [vmem:[%s1576_s5 + $0x68] sm:$0xff] %v829_v32  ;;  %877 = vst [vmem:[%s1576_s5 + $0xe8] sm:$0xff] %v845_v33  ;;  %v1131_v34 = vpop.f32.mrb[28].mxu0  ;;  %v1179_v35 = vpop.f32.mrb[28].mxu1 }
 0x13b   : > { %v1132_v36 = vpop.f32.mrb[29].mxu0  ;;  %v1180_v37 = vpop.f32.mrb[29].mxu1 }
 0x13c   : > { %v1133_v38 = vadd.f32 %v1132_v36, %v1131_v34  ;;  %v1181_v39 = vadd.f32 %v1180_v37, %v1179_v35  ;;  %v1134_v40 = vpop.f32.mrb[30].mxu0  ;;  %v1182_v41 = vpop.f32.mrb[30].mxu1 }
 0x13d   : > { %v1135_v42 = vpop.f32.mrb[31].mxu0  ;;  %v1183_v43 = vpop.f32.mrb[31].mxu1 }
 0x13e   : > { %v830_v44 = vadd.f32 %v1133_v38, %v1572_v50  ;;  %v846_v45 = vadd.f32 %v1181_v39, %v1572_v50  ;;  %v1136_v46 = vadd.f32 %v1135_v42, %v1134_v40  ;;  %v1184_v47 = vadd.f32 %v1183_v43, %v1182_v41 }
 0x140   : > { %862 = vst [vmem:[%s1576_s5 + $0x70] sm:$0xff] %v830_v44  ;;  %878 = vst [vmem:[%s1576_s5 + $0xf0] sm:$0xff] %v846_v45  ;;  %v831_v48 = vadd.f32 %v1136_v46, %v1572_v50  ;;  %v847_v49 = vadd.f32 %v1184_v47, %v1572_v50 }
 0x142   : > { %863 = vst [vmem:[%s1576_s5 + $0x78] sm:$0xff] %v831_v48  ;;  %879 = vst [vmem:[%s1576_s5 + $0xf8] sm:$0xff] %v847_v49 }
 0x143   : > { %1335 = shalt.err (!%p1332_p5)
}
 0x144   : > { %s1336_s26 = scalar_lea.hbm %s1639_s11, 4096  ;;  %s1340_s30 = scalar_lea.hbm %s1700_s3, 32768 }
 0x145   : > { %p1337_p6 = scmp.ne.s32.totalorder %s1639_s11, %s1336_s26  ;;  %p1341_p10 = scmp.lt.u32.totalorder %s1639_s11, %s1700_s3 }
 0x146   : > { %p1342_p11 = scmp.lt.u32.totalorder %s1340_s30, %s1336_s26  ;;  %p1344_p13 = scmp.lt.u32.totalorder %s1336_s26, %s1639_s11 }
 0x147   : > { %p1338_p7 = pnand %p1337_p6, %p1465_p4 }
 0x148   : > { %p1343_p12 = por %p1342_p11, %p1341_p10 }
 0x149   : > { %p1339_p9 = pneg %p1338_p7 }
 0x14a   : > { %p1345_p0 = por %p1344_p13, %p1343_p12 }
 0x14c   : > { %p1346_p1 = pnand %p1345_p0, %p1339_p9 }
 0x14e   : > { %1349 = shalt.err (!%p1346_p1)
}
 0x14f   : > { %s1403_s7 = smov 128   ;;  %s1404_s5 = smov 8  }
 0x150   : > { %1201 = dma.vmem_to_hbm [thread:$0]  (%p1465_p4), %s1641_s8, 4096, %s1639_s11, %s1651_s15, %s1403_s7, %s1403_s7, %s1404_s5  }
 0x151 PF: > { %p1207_p2 = scmp.ge.s32.totalorder %s1400_s17, 2  ;;  %s910_s28 = sand.u32 1, %s1380_s12  }
 0x152   : > { %s911_s9 = scalar_lea.sflag [#allocation3], %s910_s28 }
 0x153   : > { %p1204_p3 = pnand %p1207_p2, %p1472_p8 }
 0x155   : > { %1375 = dma.done.wait (!%p1204_p3), %s911_s9, 4096  }
 0x156   : > { %1377 = vsyncadd (!%p1204_p3), %s911_s9, 4294963200  ;;  %s16_s17 = sadd.s32 1, %s1400_s17   ;;  %s1703_s12 = smov %s1384_s13 }
 0x157   : > { %p13_p5 = scmp.ge.s32.totalorder %s16_s17, 10   ;;  %s1704_s13 = smov %s1388_s14 }
 0x158   : > { %s1705_s14 = smov %s1478_s25  ;;  %s1706_s15 = smov %s1396_s16 }
 0x159   : > { %s1707_s16 = smov %s1709_s20  ;;  %15 = sbr.rel (!%p13_p5) target bundleno = 4 (0x4), region = 77 }
 0x160   :  { %916 = vsyncpa [#allocation3], 1 }
 0x161   :  { %918 = vsyncpa [#allocation3 + $0x1], 1 }

</bundles_post_ra>
